<compile_context>
chip_gen: v6e
topology: v6e:2x2x1
jax: 0.10.0
libtpu: 0.0.40
codegen_flags: <defaults>
</compile_context>

<pallas_src>
import jax
import jax.numpy as jnp
from jax.experimental import pallas as pl
from jax.experimental.pallas import tpu as pltpu

# Small, module-consistent sizes (constructor args of SimpleTransformer).
B, S, E = 2, 8, 32          # batch, sequence, embed_dim (input_dim)
N_HEADS = 4
FF = 32                     # ff_dim
OUT = 2                     # final classifier width
OUT_PAD = 128               # lane-dense padded classifier width (sliced back to OUT)
HEAD_DIM = E // N_HEADS


def _transformer_kernel(x_ref, wqkv_ref, bqkv_ref, wo_ref, bo_ref,
                        w1_ref, b1_ref, w2_ref, b2_ref, out_ref):
    x = x_ref[...]                                           # (B, S, E) f32

    # Fused QKV projection: weights pre-transposed, canonical (.., E) @ (E, 3E).
    qkv = jnp.einsum('bse,ef->bsf', x, wqkv_ref[...],
                     preferred_element_type=jnp.float32) + bqkv_ref[...][0]   # (B, S, 3E)

    scale = 1.0 / (HEAD_DIM ** 0.5)
    q = qkv[:, :, 0 * E:1 * E] * scale                       # scale folded into q
    k = qkv[:, :, 1 * E:2 * E]
    v = qkv[:, :, 2 * E:3 * E]

    # Gather heads once into a single batch axis: (H*B, S, D), head-major.
    def gather_heads(t):
        return jnp.concatenate(
            [t[:, :, h * HEAD_DIM:(h + 1) * HEAD_DIM] for h in range(N_HEADS)],
            axis=0)

    qn, kn, vn = gather_heads(q), gather_heads(k), gather_heads(v)   # (H*B, S, D)

    # Single batched attention: one score matmul, one softmax, one p@V matmul.
    s = jnp.einsum('nqd,nkd->nqk', qn, kn,
                   preferred_element_type=jnp.float32)        # (H*B, S, S)
    s = s - jnp.max(s, axis=-1, keepdims=True)
    p = jnp.exp(s)
    inv_l = pl.reciprocal(jnp.sum(p, axis=-1, keepdims=True), approx=True)
    p = p * inv_l                                             # softmax over keys
    an = jnp.einsum('nqk,nkd->nqd', p, vn,
                    preferred_element_type=jnp.float32)       # (H*B, S, D)

    # Merge heads back along the feature axis (PyTorch concat order: h*D + d).
    attn = jnp.concatenate([an[h * B:(h + 1) * B] for h in range(N_HEADS)],
                           axis=-1)                           # (B, S, E)

    # Attention output projection (pre-transposed weight).
    attn = jnp.einsum('bse,ef->bsf', attn, wo_ref[...],
                      preferred_element_type=jnp.float32) + bo_ref[...][0]

    # Mean-pool over the sequence dimension (dim=1 in PyTorch).
    pooled = jnp.mean(attn, axis=1)                           # (B, E)

    # fc1 + ReLU (pre-transposed weight, plain A @ W).
    h1 = jnp.dot(pooled, w1_ref[...],
                 preferred_element_type=jnp.float32) + b1_ref[...][0]
    h1 = jnp.maximum(h1, 0.0)

    # fc2, padded to a lane-dense (B, 128) output tile.
    logits = jnp.dot(h1, w2_ref[...],
                     preferred_element_type=jnp.float32) + b2_ref[...][0]
    out_ref[...] = logits.astype(out_ref.dtype)               # (B, OUT_PAD)


def simple_transformer(x, params):
    """params follow the PyTorch convention:
    in_proj_weight (3E,E), in_proj_bias (3E,), out_proj.weight (E,E), out_proj.bias (E,),
    fc1.weight (FF,E), fc1.bias (FF,), fc2.weight (OUT,FF), fc2.bias (OUT,)."""
    wqkv, bqkv, wo, bo, w1, b1, w2, b2 = params

    # One-time host-side layout plumbing: contraction-ready weights, 2-D biases,
    # and a lane-dense (128-wide) classifier head.
    wqkv_t = wqkv.T                                           # (E, 3E)
    wo_t = wo.T                                               # (E, E)
    w1_t = w1.T                                               # (E, FF)
    w2_t = jnp.zeros((FF, OUT_PAD), jnp.float32).at[:, :OUT].set(w2.T)
    b2_p = jnp.zeros((1, OUT_PAD), jnp.float32).at[:, :OUT].set(b2[None, :])
    bqkv2, bo2, b1_2 = bqkv[None, :], bo[None, :], b1[None, :]

    flops = (2 * B * S * E * 3 * E                # QKV projection
             + 2 * 2 * B * N_HEADS * S * S * HEAD_DIM  # scores + p@V
             + 2 * B * S * E * E                  # out projection
             + 2 * B * E * FF                     # fc1
             + 2 * B * FF * OUT_PAD)              # fc2 (padded)
    bytes_accessed = 4 * (x.size + wqkv_t.size + bqkv2.size + wo_t.size + bo2.size
                          + w1_t.size + b1_2.size + w2_t.size + b2_p.size
                          + B * OUT_PAD)
    transcendentals = B * N_HEADS * S * S + B * N_HEADS * S   # exp + reciprocal

    vmem_spec = pl.BlockSpec(memory_space=pltpu.MemorySpace.VMEM)
    out = pl.pallas_call(
        _transformer_kernel,
        out_shape=jax.ShapeDtypeStruct((B, OUT_PAD), jnp.float32),
        in_specs=[vmem_spec] * 9,
        out_specs=vmem_spec,
        cost_estimate=pl.CostEstimate(flops=flops,
                                      transcendentals=transcendentals,
                                      bytes_accessed=bytes_accessed),
    )(x, wqkv_t, bqkv2, wo_t, bo2, w1_t, b1_2, w2_t, b2_p)
    return out[:, :OUT]


def reference(x, params):
    """Pure-JAX reference mirroring torch.nn.MultiheadAttention + fc1/fc2."""
    wqkv, bqkv, wo, bo, w1, b1, w2, b2 = params
    qkv = jnp.einsum('bse,fe->bsf', x, wqkv) + bqkv
    q, k, v = qkv[..., :E], qkv[..., E:2 * E], qkv[..., 2 * E:]

    def heads(t):
        return t.reshape(B, S, N_HEADS, HEAD_DIM).transpose(0, 2, 1, 3)

    qh, kh, vh = heads(q), heads(k), heads(v)
    s = jnp.einsum('bhqd,bhkd->bhqk', qh, kh) / (HEAD_DIM ** 0.5)
    p = jax.nn.softmax(s, axis=-1)
    a = jnp.einsum('bhqk,bhkd->bhqd', p, vh).transpose(0, 2, 1, 3).reshape(B, S, E)
    a = jnp.einsum('bse,fe->bsf', a, wo) + bo
    pooled = a.mean(axis=1)
    h1 = jax.nn.relu(pooled @ w1.T + b1)
    return h1 @ w2.T + b2


if __name__ == "__main__":
    key = jax.random.PRNGKey(0)
    keys = jax.random.split(key, 9)

    def init(k, shape, scale=0.05):
        return scale * jax.random.normal(k, shape, jnp.float32)

    params = (
        init(keys[0], (3 * E, E)),     # attn.in_proj_weight  [Wq; Wk; Wv]
        init(keys[1], (3 * E,)),       # attn.in_proj_bias
        init(keys[2], (E, E)),         # attn.out_proj.weight
        init(keys[3], (E,)),           # attn.out_proj.bias
        init(keys[4], (FF, E)),        # fc1.weight
        init(keys[5], (FF,)),          # fc1.bias
        init(keys[6], (OUT, FF)),      # fc2.weight
        init(keys[7], (OUT,)),         # fc2.bias
    )
    x = jax.random.normal(keys[8], (B, S, E), jnp.float32)

    out = jax.block_until_ready(simple_transformer(x, params))
    ref = jax.block_until_ready(reference(x, params))

    assert out.shape == (B, OUT), out.shape
    # Tolerance slightly relaxed vs 1e-4 only because of the approx (EUP) reciprocal
    # in the softmax normalization; everything else is f32-exact.
    assert jnp.allclose(out, ref, atol=1e-3, rtol=1e-3), (out, ref)
    print("KERNEL_OK")
</pallas_src>

<mosaic_0001>
module attributes {stable_mosaic.version = 11 : i64} {
  func.func @_transformer_kernel(%arg0: memref<2x8x32xf32, #tpu.memory_space<vmem>>, %arg1: memref<32x96xf32, #tpu.memory_space<vmem>>, %arg2: memref<1x96xf32, #tpu.memory_space<vmem>>, %arg3: memref<32x32xf32, #tpu.memory_space<vmem>>, %arg4: memref<1x32xf32, #tpu.memory_space<vmem>>, %arg5: memref<32x32xf32, #tpu.memory_space<vmem>>, %arg6: memref<1x32xf32, #tpu.memory_space<vmem>>, %arg7: memref<32x128xf32, #tpu.memory_space<vmem>>, %arg8: memref<1x128xf32, #tpu.memory_space<vmem>>, %arg9: memref<2x128xf32, #tpu.memory_space<vmem>>) attributes {dimension_semantics = [], scalar_prefetch = 0 : i64, scratch_operands = 0 : i64, tpu.core_type = #tpu.core_type<tc>} {
    %c0 = arith.constant 0 : index
    %c0_0 = arith.constant 0 : index
    %c0_1 = arith.constant 0 : index
    %0 = vector.load %arg0[%c0, %c0_0, %c0_1] : memref<2x8x32xf32, #tpu.memory_space<vmem>>, vector<2x8x32xf32>
    %c0_2 = arith.constant 0 : index
    %c0_3 = arith.constant 0 : index
    %1 = vector.load %arg1[%c0_2, %c0_3] : memref<32x96xf32, #tpu.memory_space<vmem>>, vector<32x96xf32>
    "tpu.trace_start"() <{level = 10 : i32, message = "bse,ef->bsf"}> : () -> ()
    %cst = arith.constant dense<0.000000e+00> : vector<2x8x96xf32>
    %2 = tpu.matmul %0, %1, %cst {dimension_numbers = #tpu.dot_dimension_numbers<[2], [0], [0, 1], [1], [0, 0, 0, 1, 1, 1], [], []>} : vector<2x8x32xf32>, vector<32x96xf32>, vector<2x8x96xf32> -> vector<2x8x96xf32>
    "tpu.trace_stop"() : () -> ()
    %c0_4 = arith.constant 0 : index
    %c0_5 = arith.constant 0 : index
    %3 = vector.load %arg2[%c0_4, %c0_5] : memref<1x96xf32, #tpu.memory_space<vmem>>, vector<1x96xf32>
    %4 = vector.shape_cast %3 : vector<1x96xf32> to vector<96xf32>
    %5 = vector.shape_cast %4 : vector<96xf32> to vector<1x1x96xf32>
    %6 = vector.broadcast %5 : vector<1x1x96xf32> to vector<2x8x96xf32>
    %7 = arith.addf %2, %6 : vector<2x8x96xf32>
    %8 = vector.extract_strided_slice %7 {offsets = [0, 0, 0], sizes = [2, 8, 32], strides = [1, 1, 1]} : vector<2x8x96xf32> to vector<2x8x32xf32>
    %cst_6 = arith.constant 0.353553385 : f32
    %9 = vector.broadcast %cst_6 : f32 to vector<2x8x32xf32>
    %10 = arith.mulf %8, %9 : vector<2x8x32xf32>
    %11 = vector.extract_strided_slice %7 {offsets = [0, 0, 32], sizes = [2, 8, 32], strides = [1, 1, 1]} : vector<2x8x96xf32> to vector<2x8x32xf32>
    %12 = vector.extract_strided_slice %7 {offsets = [0, 0, 64], sizes = [2, 8, 32], strides = [1, 1, 1]} : vector<2x8x96xf32> to vector<2x8x32xf32>
    %13 = vector.extract_strided_slice %10 {offsets = [0, 0, 0], sizes = [2, 8, 8], strides = [1, 1, 1]} : vector<2x8x32xf32> to vector<2x8x8xf32>
    %14 = vector.extract_strided_slice %10 {offsets = [0, 0, 8], sizes = [2, 8, 8], strides = [1, 1, 1]} : vector<2x8x32xf32> to vector<2x8x8xf32>
    %15 = vector.extract_strided_slice %10 {offsets = [0, 0, 16], sizes = [2, 8, 8], strides = [1, 1, 1]} : vector<2x8x32xf32> to vector<2x8x8xf32>
    %16 = vector.extract_strided_slice %10 {offsets = [0, 0, 24], sizes = [2, 8, 8], strides = [1, 1, 1]} : vector<2x8x32xf32> to vector<2x8x8xf32>
    %17 = tpu.concatenate %13, %14, %15, %16 in 0 : vector<2x8x8xf32>, vector<2x8x8xf32>, vector<2x8x8xf32>, vector<2x8x8xf32> -> vector<8x8x8xf32>
    %18 = vector.extract_strided_slice %11 {offsets = [0, 0, 0], sizes = [2, 8, 8], strides = [1, 1, 1]} : vector<2x8x32xf32> to vector<2x8x8xf32>
    %19 = vector.extract_strided_slice %11 {offsets = [0, 0, 8], sizes = [2, 8, 8], strides = [1, 1, 1]} : vector<2x8x32xf32> to vector<2x8x8xf32>
    %20 = vector.extract_strided_slice %11 {offsets = [0, 0, 16], sizes = [2, 8, 8], strides = [1, 1, 1]} : vector<2x8x32xf32> to vector<2x8x8xf32>
    %21 = vector.extract_strided_slice %11 {offsets = [0, 0, 24], sizes = [2, 8, 8], strides = [1, 1, 1]} : vector<2x8x32xf32> to vector<2x8x8xf32>
    %22 = tpu.concatenate %18, %19, %20, %21 in 0 : vector<2x8x8xf32>, vector<2x8x8xf32>, vector<2x8x8xf32>, vector<2x8x8xf32> -> vector<8x8x8xf32>
    %23 = vector.extract_strided_slice %12 {offsets = [0, 0, 0], sizes = [2, 8, 8], strides = [1, 1, 1]} : vector<2x8x32xf32> to vector<2x8x8xf32>
    %24 = vector.extract_strided_slice %12 {offsets = [0, 0, 8], sizes = [2, 8, 8], strides = [1, 1, 1]} : vector<2x8x32xf32> to vector<2x8x8xf32>
    %25 = vector.extract_strided_slice %12 {offsets = [0, 0, 16], sizes = [2, 8, 8], strides = [1, 1, 1]} : vector<2x8x32xf32> to vector<2x8x8xf32>
    %26 = vector.extract_strided_slice %12 {offsets = [0, 0, 24], sizes = [2, 8, 8], strides = [1, 1, 1]} : vector<2x8x32xf32> to vector<2x8x8xf32>
    %27 = tpu.concatenate %23, %24, %25, %26 in 0 : vector<2x8x8xf32>, vector<2x8x8xf32>, vector<2x8x8xf32>, vector<2x8x8xf32> -> vector<8x8x8xf32>
    "tpu.trace_start"() <{level = 10 : i32, message = "nqd,nkd->nqk"}> : () -> ()
    %cst_7 = arith.constant dense<0.000000e+00> : vector<8x8x8xf32>
    %28 = tpu.matmul %17, %22, %cst_7 {dimension_numbers = #tpu.dot_dimension_numbers<[2], [2], [1], [1], [0, 0, 0, 1, 1, 1], [0], [0]>} : vector<8x8x8xf32>, vector<8x8x8xf32>, vector<8x8x8xf32> -> vector<8x8x8xf32>
    "tpu.trace_stop"() : () -> ()
    %cst_8 = arith.constant dense<0xFF800000> : vector<8x8xf32>
    %29 = vector.multi_reduction <maximumf>, %28, %cst_8 [2] : vector<8x8x8xf32> to vector<8x8xf32>
    %30 = vector.shape_cast %29 : vector<8x8xf32> to vector<8x8x1xf32>
    %31 = vector.broadcast %30 : vector<8x8x1xf32> to vector<8x8x8xf32>
    %32 = arith.subf %28, %31 : vector<8x8x8xf32>
    %33 = math.exp %32 : vector<8x8x8xf32>
    %cst_9 = arith.constant dense<0.000000e+00> : vector<8x8xf32>
    %34 = vector.multi_reduction <add>, %33, %cst_9 [2] : vector<8x8x8xf32> to vector<8x8xf32>
    %35 = vector.shape_cast %34 : vector<8x8xf32> to vector<8x8x1xf32>
    %36 = tpu.reciprocal %35 {approx = true} : vector<8x8x1xf32> -> vector<8x8x1xf32>
    %37 = vector.broadcast %36 : vector<8x8x1xf32> to vector<8x8x8xf32>
    %38 = arith.mulf %33, %37 : vector<8x8x8xf32>
    "tpu.trace_start"() <{level = 10 : i32, message = "nqk,nkd->nqd"}> : () -> ()
    %cst_10 = arith.constant dense<0.000000e+00> : vector<8x8x8xf32>
    %39 = tpu.matmul %38, %27, %cst_10 {dimension_numbers = #tpu.dot_dimension_numbers<[2], [1], [1], [2], [0, 0, 0, 1, 1, 2], [0], [0]>} : vector<8x8x8xf32>, vector<8x8x8xf32>, vector<8x8x8xf32> -> vector<8x8x8xf32>
    "tpu.trace_stop"() : () -> ()
    %40 = vector.extract_strided_slice %39 {offsets = [0, 0, 0], sizes = [2, 8, 8], strides = [1, 1, 1]} : vector<8x8x8xf32> to vector<2x8x8xf32>
    %41 = vector.extract_strided_slice %39 {offsets = [2, 0, 0], sizes = [2, 8, 8], strides = [1, 1, 1]} : vector<8x8x8xf32> to vector<2x8x8xf32>
    %42 = vector.extract_strided_slice %39 {offsets = [4, 0, 0], sizes = [2, 8, 8], strides = [1, 1, 1]} : vector<8x8x8xf32> to vector<2x8x8xf32>
    %43 = vector.extract_strided_slice %39 {offsets = [6, 0, 0], sizes = [2, 8, 8], strides = [1, 1, 1]} : vector<8x8x8xf32> to vector<2x8x8xf32>
    %44 = tpu.concatenate %40, %41, %42, %43 in 2 : vector<2x8x8xf32>, vector<2x8x8xf32>, vector<2x8x8xf32>, vector<2x8x8xf32> -> vector<2x8x32xf32>
    %c0_11 = arith.constant 0 : index
    %c0_12 = arith.constant 0 : index
    %45 = vector.load %arg3[%c0_11, %c0_12] : memref<32x32xf32, #tpu.memory_space<vmem>>, vector<32x32xf32>
    "tpu.trace_start"() <{level = 10 : i32, message = "bse,ef->bsf"}> : () -> ()
    %cst_13 = arith.constant dense<0.000000e+00> : vector<2x8x32xf32>
    %46 = tpu.matmul %44, %45, %cst_13 {dimension_numbers = #tpu.dot_dimension_numbers<[2], [0], [0, 1], [1], [0, 0, 0, 1, 1, 1], [], []>} : vector<2x8x32xf32>, vector<32x32xf32>, vector<2x8x32xf32> -> vector<2x8x32xf32>
    "tpu.trace_stop"() : () -> ()
    %c0_14 = arith.constant 0 : index
    %c0_15 = arith.constant 0 : index
    %47 = vector.load %arg4[%c0_14, %c0_15] : memref<1x32xf32, #tpu.memory_space<vmem>>, vector<1x32xf32>
    %48 = vector.shape_cast %47 : vector<1x32xf32> to vector<32xf32>
    %49 = vector.shape_cast %48 : vector<32xf32> to vector<1x1x32xf32>
    %50 = vector.broadcast %49 : vector<1x1x32xf32> to vector<2x8x32xf32>
    %51 = arith.addf %46, %50 : vector<2x8x32xf32>
    %cst_16 = arith.constant dense<0.000000e+00> : vector<2x32xf32>
    %52 = vector.multi_reduction <add>, %51, %cst_16 [1] : vector<2x8x32xf32> to vector<2x32xf32>
    %cst_17 = arith.constant 8.000000e+00 : f32
    %53 = vector.broadcast %cst_17 : f32 to vector<2x32xf32>
    %54 = arith.divf %52, %53 : vector<2x32xf32>
    %c0_18 = arith.constant 0 : index
    %c0_19 = arith.constant 0 : index
    %55 = vector.load %arg5[%c0_18, %c0_19] : memref<32x32xf32, #tpu.memory_space<vmem>>, vector<32x32xf32>
    %cst_20 = arith.constant dense<0.000000e+00> : vector<2x32xf32>
    %56 = tpu.matmul %54, %55, %cst_20 {dimension_numbers = #tpu.dot_dimension_numbers<[1], [0], [0], [1], [0, 0, 1, 1], [], []>} : vector<2x32xf32>, vector<32x32xf32>, vector<2x32xf32> -> vector<2x32xf32>
    %c0_21 = arith.constant 0 : index
    %c0_22 = arith.constant 0 : index
    %57 = vector.load %arg6[%c0_21, %c0_22] : memref<1x32xf32, #tpu.memory_space<vmem>>, vector<1x32xf32>
    %58 = vector.shape_cast %57 : vector<1x32xf32> to vector<32xf32>
    %59 = vector.shape_cast %58 : vector<32xf32> to vector<1x32xf32>
    %60 = vector.broadcast %59 : vector<1x32xf32> to vector<2x32xf32>
    %61 = arith.addf %56, %60 : vector<2x32xf32>
    %cst_23 = arith.constant 0.000000e+00 : f32
    %62 = vector.broadcast %cst_23 : f32 to vector<2x32xf32>
    %63 = arith.maximumf %61, %62 : vector<2x32xf32>
    %c0_24 = arith.constant 0 : index
    %c0_25 = arith.constant 0 : index
    %64 = vector.load %arg7[%c0_24, %c0_25] : memref<32x128xf32, #tpu.memory_space<vmem>>, vector<32x128xf32>
    %cst_26 = arith.constant dense<0.000000e+00> : vector<2x128xf32>
    %65 = tpu.matmul %63, %64, %cst_26 {dimension_numbers = #tpu.dot_dimension_numbers<[1], [0], [0], [1], [0, 0, 1, 1], [], []>} : vector<2x32xf32>, vector<32x128xf32>, vector<2x128xf32> -> vector<2x128xf32>
    %c0_27 = arith.constant 0 : index
    %c0_28 = arith.constant 0 : index
    %66 = vector.load %arg8[%c0_27, %c0_28] : memref<1x128xf32, #tpu.memory_space<vmem>>, vector<1x128xf32>
    %67 = vector.shape_cast %66 : vector<1x128xf32> to vector<128xf32>
    %68 = vector.shape_cast %67 : vector<128xf32> to vector<1x128xf32>
    %69 = vector.broadcast %68 : vector<1x128xf32> to vector<2x128xf32>
    %70 = arith.addf %65, %69 : vector<2x128xf32>
    %c0_29 = arith.constant 0 : index
    %c0_30 = arith.constant 0 : index
    %71 = vector.load %arg9[%c0_29, %c0_30] : memref<2x128xf32, #tpu.memory_space<vmem>>, vector<2x128xf32>
    tpu.vector_store %arg9[%c0_29, %c0_30], %70 {strides = array<i32>} : memref<2x128xf32, #tpu.memory_space<vmem>>, vector<2x128xf32>,
    return
  }
}

</mosaic_0001>

<bundles_post_ra>
// kernel: tpu_custom_call.1
= control target key start
LH: loop header
LB: loop body
LE: loop exit
PB: predicated region body
PF: predicated region fallthrough
CT: control target
= control target key end

     0   :  { %14 = vsyncpa [#allocation3], 0  ;;  %s2555_s0 = inlined_call_operand.hbm [shape: f32[2,8,32], index: 0, kind: input, shape index: {}]   ;;  %s2556_s1 = inlined_call_operand.hbm [shape: f32[32,96], index: 1, kind: input, shape index: {}]   ;;  %s2557_s2 = inlined_call_operand.vmem [shape: f32[1,96], index: 2, kind: input, shape index: {}]   ;;  %s2558_s3 = inlined_call_operand.hbm [shape: f32[32,32], index: 3, kind: input, shape index: {}]   ;;  %s2559_s4 = inlined_call_operand.vmem [shape: f32[1,32], index: 4, kind: input, shape index: {}]   ;;  %s2560_s5 = inlined_call_operand.hbm [shape: f32[32,32], index: 5, kind: input, shape index: {}]   ;;  %s2561_s6 = inlined_call_operand.vmem [shape: f32[1,32], index: 6, kind: input, shape index: {}]   ;;  %s2562_s7 = inlined_call_operand.hbm [shape: f32[32,128], index: 7, kind: input, shape index: {}]   ;;  %s2563_s8 = inlined_call_operand.vmem [shape: f32[1,128], index: 8, kind: input, shape index: {}]   ;;  %s2564_s9 = inlined_call_operand.hbm [shape: f32[2,128], index: 9, kind: output, shape index: {}]  }
   0x1   :  { %15 = vsyncpa [#allocation6], 0 }
   0x2   :  { %16 = vsyncpa [#allocation9], 0 }
   0x3   :  { %17 = vsyncpa [#allocation4], 0  ;;  %s2251_s30 = smov [#allocation5]   ;;  %s2252_s11 = smov [#allocation8]  }
   0x4   :  { %s35_s10 = sshll.u32 %s2251_s30, 4  ;;  %s63_s12 = sshll.u32 %s2252_s11, 4  ;;  %s36_s10 = int_to_ptr.vmem [resolvable:$true] %s35_s10  ;;  %s64_s12 = int_to_ptr.vmem [resolvable:$true] %s63_s12 }
   0x5   :  { %s2131_s13 = scalar_lea.vmem %s36_s10, 512  ;;  %p2136_p1 = scmp.lt.s32.totalorder %s36_s10, %s36_s10 }
   0x6   :  { %p2132_p0 = scmp.ne.s32.totalorder %s36_s10, %s2131_s13  ;;  %p2137_p2 = scmp.lt.s32.totalorder %s2131_s13, %s2131_s13 }
   0x8   :  { %p2138_p3 = por %p2137_p2, %p2136_p1 }
   0xa   :  { %p2139_p4 = pnand %p2138_p3, %p2132_p0 }
   0xc   :  { %2142 = shalt.err (!%p2139_p4)
}
   0xd   :  { %s2253_s14 = smov 128   ;;  %s2254_s15 = smov 8  }
   0xe   :  { %41 = dma.hbm_to_vmem [thread:$0]  %s2556_s1, 512, %s36_s10, [#allocation6], %s2253_s14, %s2253_s14, %s2254_s15  }
   0xf   :  { %s2151_s18 = scalar_lea.vmem %s64_s12, 512  ;;  %p2156_p6 = scmp.lt.s32.totalorder %s64_s12, %s64_s12 }
  0x10   :  { %p2152_p5 = scmp.ne.s32.totalorder %s64_s12, %s2151_s18  ;;  %p2157_p7 = scmp.lt.s32.totalorder %s2151_s18, %s2151_s18 }
  0x12   :  { %p2158_p8 = por %p2157_p7, %p2156_p6 }
  0x14   :  { %p2159_p9 = pnand %p2158_p8, %p2152_p5 }
  0x16   :  { %2162 = shalt.err (!%p2159_p9)
}
  0x17   :  { %69 = dma.hbm_to_vmem [thread:$0]  %s2560_s5, 512, %s64_s12, [#allocation9], %s2253_s14, %s2253_s14, %s2254_s15  }
  0x18   :  { %s2255_s21 = smov [#allocation2]   ;;  %s2256_s23 = smov [#allocation7]  }
  0x19   :  { %s23_s22 = sshll.u32 %s2255_s21, 4  ;;  %s49_s24 = sshll.u32 %s2256_s23, 4  ;;  %s24_s22 = int_to_ptr.vmem [resolvable:$true] %s23_s22  ;;  %s50_s24 = int_to_ptr.vmem [resolvable:$true] %s49_s24 }
  0x1a   :  { %s2171_s1 = scalar_lea.vmem %s24_s22, 256  ;;  %p2176_p11 = scmp.lt.s32.totalorder %s24_s22, %s24_s22 }
  0x1b   :  { %p2172_p10 = scmp.ne.s32.totalorder %s24_s22, %s2171_s1  ;;  %p2177_p12 = scmp.lt.s32.totalorder %s2171_s1, %s2171_s1 }
  0x1d   :  { %p2178_p13 = por %p2177_p12, %p2176_p11 }
  0x1f   :  { %p2179_p0 = pnand %p2178_p13, %p2172_p10 }
  0x21   :  { %2182 = shalt.err (!%p2179_p0)
}
  0x22   :  { %29 = dma.hbm_to_vmem [thread:$0]  %s2555_s0, 256, %s24_s22, [#allocation3], %s2253_s14, %s2253_s14, %s2254_s15  }
  0x23   :  { %s2191_s5 = scalar_lea.vmem %s50_s24, 512  ;;  %p2196_p2 = scmp.lt.s32.totalorder %s50_s24, %s50_s24 }
  0x24   :  { %p2192_p1 = scmp.ne.s32.totalorder %s50_s24, %s2191_s5  ;;  %p2197_p3 = scmp.lt.s32.totalorder %s2191_s5, %s2191_s5 }
  0x26   :  { %p2198_p4 = por %p2197_p3, %p2196_p2 }
  0x28   :  { %p2199_p5 = pnand %p2198_p4, %p2192_p1 }
  0x2a   :  { %2202 = shalt.err (!%p2199_p5)
}
  0x2b   :  { %55 = dma.hbm_to_vmem [thread:$0]  %s2558_s3, 512, %s50_s24, [#allocation6], %s2253_s14, %s2253_s14, %s2254_s15  }
  0x2c   :  { %s2257_s29 = smov [#allocation10]  }
  0x2d   :  { %s77_s30 = sshll.u32 %s2257_s29, 4  ;;  %s78_s30 = int_to_ptr.vmem [resolvable:$true] %s77_s30 }
  0x2e   :  { %s2211_s10 = scalar_lea.vmem %s78_s30, 512  ;;  %p2216_p7 = scmp.lt.s32.totalorder %s78_s30, %s78_s30 }
  0x2f   :  { %p2212_p6 = scmp.ne.s32.totalorder %s78_s30, %s2211_s10  ;;  %p2217_p8 = scmp.lt.s32.totalorder %s2211_s10, %s2211_s10 }
  0x31   :  { %p2218_p9 = por %p2217_p8, %p2216_p7 }
  0x33   :  { %p2219_p10 = pnand %p2218_p9, %p2212_p6 }
  0x35   :  { %2222 = shalt.err (!%p2219_p10)
}
  0x36   :  { %83 = dma.hbm_to_vmem [thread:$0]  %s2562_s7, 512, %s78_s30, [#allocation9], %s2253_s14, %s2253_s14, %s2254_s15  }
  0x37   :  { %2243 = dma.done.wait [#allocation3], 256  }
  0x38   :  { %2244 = vsyncadd [#allocation3], 4294967040 }
  0x39   :  { %2245 = dma.done.wait [#allocation6], 1024  }
  0x3a   :  { %2246 = vsyncadd [#allocation6], 4294966272 }
  0x3b   :  { %2247 = dma.done.wait [#allocation9], 1024  }
  0x3c   :  { %2248 = vsyncadd [#allocation9], 4294966272  ;;  %vm114_vm0 = vcmask 261120   ;;  %v106_v0 = vld [vmem:[#allocation5 + $0x18] sm:$0xff]  ;;  %v105_v1 = vld [vmem:[#allocation5 + $0x10] sm:$0xff]  ;;  %v2258_v7 = vmov 0.0  }
  0x3d   :  { %1950 = vmatprep.subr.mxu0 %v106_v0  ;;  %v101_v2 = vld [vmem:[#allocation2] sm:$0xff]  ;;  %v104_v3 = vld [vmem:[#allocation5 + $0x8] sm:$0xff]  ;;  %v103_v4 = vld [vmem:[#allocation5] sm:$0xff]  ;;  %1961 = vmatprep.subr.mxu1 %v2258_v7  ;;  %s2259_s12 = smov 112   ;;  %s2260_s13 = smov 120   ;;  %vm2261_vm1 = vmmov 0  }
  0x3e   :  { %1951 = vmatpush3.msra.mxu0 %v106_v0  ;;  %1958 = vmatprep.mubr.msk.f32.mxu0 %vm114_vm0, %v101_v2  ;;  %v102_v5 = vld [vmem:[#allocation2 + $0x8] sm:$0xff]  ;;  %v1862_v8 = vld [vmem:[%s2557_s2] ss:$0 sm:$0xff]  ;;  %s2262_s2 = smov 104   ;;  %s2263_s14 = smov 96   ;;  %vm228_vm2 = vcmask 64512  }
  0x3f   :  { %1952 = vmatprep.subr.mxu0 %v105_v1  ;;  %1963 = vmatprep.mubr.msk.f32.mxu1 %vm2261_vm1, %v2258_v7  ;;  %s2264_s16 = smov 64   ;;  %s2265_s17 = smov 16   ;;  %vm1557_vm3 = vcmask 130048   ;;  %vm1560_vm4 = vcmask 195584   ;;  %vm1685_vm5 = vcmask 1041409  }
  0x40   :  { %1953 = vmatpush3.msra.mxu0 %v105_v1  ;;  %s2266_s18 = smov 24   ;;  %s2267_s23 = smov [#allocation11]  }
  0x41   :  { %1954 = vmatprep.subr.mxu0 %v104_v3  ;;  %s1851_s24 = sshll.u32 %s2267_s23, 4  ;;  %s1852_s24 = int_to_ptr.vmem [resolvable:$true] %s1851_s24 }
  0x42   :  { %1955 = vmatpush3.msra.mxu0 %v104_v3  ;;  %s2223_s1 = scalar_lea.vmem %s1852_s24, 32  ;;  %p2228_p12 = scmp.lt.s32.totalorder %s1852_s24, %s1852_s24 }
  0x43   :  { %1956 = vmatprep.subr.mxu0 %v103_v4  ;;  %p2224_p11 = scmp.ne.s32.totalorder %s1852_s24, %s2223_s1  ;;  %p2229_p13 = scmp.lt.s32.totalorder %s2223_s1, %s2223_s1 }
  0x44   :  { %1957 = vmatpush3.msra.mxu0 %v103_v4 }
  0x45   :  { %1959 = vmatmul.mubr.msk.f32.vlgmr.msra.gmra.mxu0 %vm114_vm0, %v102_v5  ;;  %1981 = vmatprep.subr.mxu0 %v2258_v7  ;;  %p2230_p0 = por %p2229_p13, %p2228_p12 }
  0x46   :  { %1983 = vmatprep.mubr.msk.f32.mxu0 %vm2261_vm1, %v2258_v7 }
  0x47   :  { %p2231_p1 = pnand %p2230_p0, %p2224_p11 }
 0x105   :  { %v1960_v6 = vpop.f32.mrf.mxu0 }
 0x106   :  { %v2364_v11 = vadd.f32 %v1960_v6, %v1862_v8 }
 0x107   :  { %v187_v9 = vpop.f32.mrf.mxu0 }
 0x108   :  { %v2355_v10 = vadd.f32 %v1862_v8, %v187_v9  ;;  %v197_v12 = vmul.f32 0.35355338, %v2364_v11 }
 0x10a   :  { %218 = vrot.lane.b32.xlu1 %v2355_v10, %s2259_s12  ;;  %214 = vrot.lane.b32.xlu0 %v2355_v10, %s2260_s13  ;;  %v196_v13 = vmul.f32 0.35355338, %v2355_v10 }
 0x10e   :  { %220 = vrot.lane.b32.xlu1 %v2364_v11, %s2259_s12  ;;  %216 = vrot.lane.b32.xlu0 %v2364_v11, %s2260_s13 }
 0x112   :  { %224 = vrot.lane.b32.xlu1 %v2364_v11, %s2262_s2  ;;  %222 = vrot.lane.b32.xlu0 %v2355_v10, %s2262_s2 }
 0x116   :  { %303 = vrot.lane.b32.xlu1 %v2364_v11, %s2263_s14  ;;  %226 = vrot.lane.b32.xlu0 %v2355_v10, %s2263_s14 }
 0x11a   :  { %202 = vrot.lane.b32.xlu1 %v197_v12, %s2260_s13 }
 0x11e   :  { %200 = vrot.lane.b32.xlu1 %v196_v13, %s2260_s13 }
 0x17c   :  { %v2379_v14 = vpop.permute.xlu1 %218  ;;  %v2381_v15 = vpop.permute.xlu0 %214 }
 0x180   :  { %v2383_v16 = vpop.permute.xlu1 %220  ;;  %v2385_v17 = vpop.permute.xlu0 %216 }
 0x181   :  { %455 = vrot.lane.b32.xlu0 %v2385_v17, %s2263_s14  ;;  %607 = vrot.lane.b32.xlu1 %v2383_v16, %s2263_s14 }
 0x184   :  { %v2391_v18 = vpop.permute.xlu0 %222  ;;  %v2396_v19 = vpop.permute.xlu1 %224 }
 0x185   :  { %379 = vrot.lane.b32.xlu0 %v2381_v15, %s2263_s14  ;;  %206 = vrot.lane.b32.xlu1 %v197_v12, %s2259_s12 }
 0x188   :  { %v227_v20 = vpop.permute.xlu0 %226  ;;  %v304_v21 = vpop.permute.xlu1 %303 }
 0x189   :  { %1962 = vmatpush3.xpose.msk.msra.mxu1 %vm228_vm2, %v227_v20  ;;  %204 = vrot.lane.b32.xlu0 %v196_v13, %s2259_s12 }
 0x18a   :  { %759 = vrot.lane.b32.xlu1 %v2396_v19, %s2263_s14  ;;  %1966 = vmatprep.subr.mxu1 %v2258_v7 }
 0x18c   :  { %1964 = vmatmul.mubr.msk.f32.vlgmr.msra.gmra.mxu1 %vm228_vm2, %v196_v13  ;;  %v203_v22 = vpop.permute.xlu1 %202 }
 0x18d   :  { %531 = vrot.lane.b32.xlu0 %v2379_v14, %s2263_s14  ;;  %1967 = vmatpush3.xpose.msk.msra.mxu1 %vm228_vm2, %v304_v21 }
 0x18e   :  { %210 = vrot.lane.b32.xlu1 %v197_v12, %s2262_s2  ;;  %1968 = vmatprep.mubr.msk.f32.mxu1 %vm2261_vm1, %v2258_v7 }
 0x18f   :  { %1971 = vmatprep.subr.mxu1 %v2258_v7 }
 0x190   :  { %1969 = vmatmul.mubr.msk.f32.vlgmr.msra.gmra.mxu1 %vm228_vm2, %v197_v12  ;;  %v201_v23 = vpop.permute.xlu1 %200 }
 0x191   :  { %683 = vrot.lane.b32.xlu0 %v2391_v18, %s2263_s14  ;;  %1973 = vmatprep.mubr.msk.f32.mxu1 %vm2261_vm1, %v2258_v7 }
 0x195   :  { %208 = vrot.lane.b32.xlu0 %v196_v13, %s2262_s2 }
 0x1f3   :  { %v456_v24 = vpop.permute.xlu0 %455  ;;  %v608_v25 = vpop.permute.xlu1 %607 }
 0x1f7   :  { %v380_v26 = vpop.permute.xlu0 %379  ;;  %v207_v27 = vpop.permute.xlu1 %206 }
 0x1f8   :  { %1972 = vmatpush3.xpose.msk.msra.mxu1 %vm228_vm2, %v380_v26 }
 0x1f9   :  { %1976 = vmatprep.subr.mxu1 %v2258_v7 }
 0x1fb   :  { %v205_v28 = vpop.permute.xlu0 %204  ;;  %1974 = vmatmul.mubr.msk.f32.vlgmr.msra.gmra.mxu1 %vm228_vm2, %v201_v23 }
 0x1fc   :  { %1977 = vmatpush3.xpose.msk.msra.mxu1 %vm228_vm2, %v456_v24  ;;  %1978 = vmatprep.mubr.msk.f32.mxu1 %vm2261_vm1, %v2258_v7  ;;  %v760_v30 = vpop.permute.xlu1 %759 }
 0x1fd   :  { %1986 = vmatprep.subr.mxu1 %v2258_v7 }
 0x1ff   :  { %v532_v29 = vpop.permute.xlu0 %531  ;;  %1979 = vmatmul.mubr.msk.f32.vlgmr.msra.gmra.mxu1 %vm228_vm2, %v203_v22 }
 0x200   :  { %1982 = vmatpush3.xpose.msk.msra.mxu0 %vm228_vm2, %v532_v29  ;;  %1987 = vmatpush3.xpose.msk.msra.mxu1 %vm228_vm2, %v608_v25  ;;  %v211_v32 = vpop.permute.xlu1 %210 }
 0x201   :  { %1988 = vmatprep.mubr.msk.f32.mxu1 %vm2261_vm1, %v2258_v7  ;;  %1991 = vmatprep.subr.mxu0 %v2258_v7 }
 0x202   :  { %1996 = vmatprep.subr.mxu1 %v2258_v7 }
 0x203   :  { %1984 = vmatmul.mubr.msk.f32.vlgmr.msra.gmra.mxu0 %vm228_vm2, %v205_v28  ;;  %v684_v31 = vpop.permute.xlu0 %683  ;;  %1989 = vmatmul.mubr.msk.f32.vlgmr.msra.gmra.mxu1 %vm228_vm2, %v207_v27 }
 0x204   :  { %1992 = vmatpush3.xpose.msk.msra.mxu0 %vm228_vm2, %v684_v31  ;;  %1997 = vmatpush3.xpose.msk.msra.mxu1 %vm228_vm2, %v760_v30 }
 0x205   :  { %1998 = vmatprep.mubr.msk.f32.mxu1 %vm2261_vm1, %v2258_v7  ;;  %1993 = vmatprep.mubr.msk.f32.mxu0 %vm2261_vm1, %v2258_v7 }
 0x206   :  { %2006 = vmatprep.subr.mxu1 %v2258_v7  ;;  %2001 = vmatprep.subr.mxu0 %v2258_v7 }
 0x207   :  { %v209_v33 = vpop.permute.xlu0 %208  ;;  %1999 = vmatmul.mubr.msk.f32.vlgmr.msra.gmra.mxu1 %vm228_vm2, %v211_v32 }
 0x208   :  { %1994 = vmatmul.mubr.msk.f32.vlgmr.msra.gmra.mxu0 %vm228_vm2, %v209_v33  ;;  %2008 = vmatprep.mubr.msk.f32.mxu1 %vm2261_vm1, %v2258_v7 }
 0x209   :  { %2003 = vmatprep.mubr.msk.f32.mxu0 %vm2261_vm1, %v2258_v7 }
 0x24c   :  { %v299_v34 = vpop.f32.mrf.mxu1 }
 0x24d   :  { %v835_v35 = vsel %vm228_vm2, %v299_v34, -inf }
 0x24e   :  { %836 = vmax.xlane.f32.xlu0 %v835_v35  ;;  %v1965_v36 = vpop.f32.mrf.mxu1 }
 0x250   :  { %v375_v37 = vpop.f32.mrf.mxu1 }
 0x251   :  { %v838_v38 = vsel %vm228_vm2, %v375_v37, -inf }
 0x252   :  { %839 = vmax.xlane.f32.xlu1 %v838_v38  ;;  %v1970_v39 = vpop.f32.mrf.mxu1 }
 0x2bb   :  { %v451_v40 = vpop.f32.mrf.mxu1 }
 0x2bc   :  { %v841_v41 = vsel %vm228_vm2, %v451_v40, -inf }
 0x2bd   :  { %842 = vmax.xlane.f32.xlu0 %v841_v41  ;;  %v1975_v42 = vpop.f32.mrf.mxu1 }
 0x2bf   :  { %v527_v43 = vpop.f32.mrf.mxu1 }
 0x2c0   :  { %v844_v44 = vsel %vm228_vm2, %v527_v43, -inf }
 0x2c1   :  { %845 = vmax.xlane.f32.xlu0 %v844_v44  ;;  %v1980_v45 = vpop.f32.mrf.mxu1 }
 0x2c3   :  { %v603_v46 = vpop.f32.mrf.mxu0  ;;  %v679_v47 = vpop.f32.mrf.mxu1 }
 0x2c4   :  { %v847_v48 = vsel %vm228_vm2, %v603_v46, -inf  ;;  %v850_v49 = vsel %vm228_vm2, %v679_v47, -inf }
 0x2c5   :  { %v1985_v50 = vpop.f32.mrf.mxu0  ;;  %848 = vmax.xlane.f32.xlu1 %v847_v48  ;;  %851 = vmax.xlane.f32.xlu0 %v850_v49  ;;  %v1990_v51 = vpop.f32.mrf.mxu1 }
 0x2c7   :  { %v831_v52 = vpop.f32.mrf.mxu1 }
 0x2c8   :  { %v755_v53 = vpop.f32.mrf.mxu0  ;;  %v856_v54 = vsel %vm228_vm2, %v831_v52, -inf }
 0x2c9   :  { %857 = vmax.xlane.f32.xlu0 %v856_v54  ;;  %v2000_v55 = vpop.f32.mrf.mxu1  ;;  %v853_v56 = vsel %vm228_vm2, %v755_v53, -inf }
 0x2ca   :  { %v1995_v57 = vpop.f32.mrf.mxu0  ;;  %854 = vmax.xlane.f32.xlu1 %v853_v56 }
 0x2d7   :  { %v837_v61 = vpop.xlane.xlu0 %836 }
 0x2d8   :  { %v859_v62 = vsub.f32 %v299_v34, %v837_v61 }
 0x2da   :  { %v867_v63 = vmul.f32 1.442695, %v859_v62 }
 0x2db   :  { %923 = vrot.lane.b32.xlu1 %v2355_v10, %s2264_s16  ;;  %v840_v58 = vpop.xlane.xlu1 %839 }
 0x2dc   :  { %v860_v59 = vsub.f32 %v375_v37, %v840_v58 }
 0x2de   :  { %v869_v60 = vmul.f32 1.442695, %v860_v59 }
 0x2df   :  { %1075 = vrot.lane.b32.xlu1 %v2381_v15, %s2264_s16  ;;  %999 = vrot.lane.b32.xlu0 %v2364_v11, %s2264_s16 }
 0x2e0   :  { %2091 = vpow2.f32 %v869_v60 }
 0x2e1   :  { %2093 = vpow2.f32 %v867_v63 }
 0x2e3   :  { %1151 = vrot.lane.b32.xlu1 %v2385_v17, %s2264_s16  ;;  %1227 = vrot.lane.b32.xlu0 %v2379_v14, %s2264_s16 }
 0x2e7   :  { %1303 = vrot.lane.b32.xlu1 %v2383_v16, %s2264_s16 }
 0x2ed   :  { %v2467_v0 = vpop.eup %2091 }
 0x2ee   :  { %v886_v1 = vsel %vm228_vm2, %v2467_v0, 0.0  ;;  %v2471_v2 = vpop.eup %2093 }
 0x2ef   :  { %v883_v3 = vsel %vm228_vm2, %v2471_v2, 0.0 }
 0x302   :  { %887 = vadd.xlane.f32.xlu0 %v886_v1 }
 0x30b   :  { %884 = vadd.xlane.f32.xlu1 %v883_v3 }
 0x346   :  { %v843_v4 = vpop.xlane.xlu0 %842 }
 0x347   :  { %v861_v5 = vsub.f32 %v451_v40, %v843_v4 }
 0x349   :  { %v871_v6 = vmul.f32 1.442695, %v861_v5 }
 0x34a   :  { %v846_v8 = vpop.xlane.xlu0 %845 }
 0x34b   :  { %2095 = vpow2.f32 %v871_v6  ;;  %v862_v9 = vsub.f32 %v527_v43, %v846_v8  ;;  %v1566_v8 = vld [vmem:[#allocation7 + $0x18] sm:$0xff] }
 0x34d   :  { %v873_v10 = vmul.f32 1.442695, %v862_v9  ;;  %v1565_v9 = vld [vmem:[#allocation7 + $0x10] sm:$0xff] }
 0x34e   :  { %v849_v11 = vpop.xlane.xlu1 %848  ;;  %v852_v12 = vpop.xlane.xlu0 %851 }
 0x34f   :  { %2097 = vpow2.f32 %v873_v10  ;;  %v863_v13 = vsub.f32 %v603_v46, %v849_v11  ;;  %v864_v14 = vsub.f32 %v679_v47, %v852_v12  ;;  %v1564_v10 = vld [vmem:[#allocation7 + $0x8] sm:$0xff] }
 0x351   :  { %v875_v15 = vmul.f32 1.442695, %v863_v13  ;;  %v877_v16 = vmul.f32 1.442695, %v864_v14  ;;  %v1563_v13 = vld [vmem:[#allocation7] sm:$0xff] }
 0x352   :  { %v858_v17 = vpop.xlane.xlu0 %857 }
 0x353   :  { %2099 = vpow2.f32 %v875_v15  ;;  %v866_v20 = vsub.f32 %v831_v52, %v858_v17  ;;  %v855_v21 = vpop.xlane.xlu1 %854 }
 0x354   :  { %2101 = vpow2.f32 %v877_v16  ;;  %v865_v22 = vsub.f32 %v755_v53, %v855_v21 }
 0x355   :  { %v881_v23 = vmul.f32 1.442695, %v866_v20 }
 0x356   :  { %v879_v24 = vmul.f32 1.442695, %v865_v22  ;;  %v1000_v25 = vpop.permute.xlu0 %999 }
 0x357   :  { %2103 = vpow2.f32 %v881_v23  ;;  %v924_v26 = vpop.permute.xlu1 %923  ;;  %2007 = vmatpush3.msra.mxu1 %v1000_v25 }
 0x358   :  { %v2096_v27 = vpop.eup %2095  ;;  %2105 = vpow2.f32 %v879_v24  ;;  %2002 = vmatpush3.msra.mxu0 %v924_v26  ;;  %2016 = vmatprep.subr.mxu1 %v2258_v7 }
 0x359   :  { %v889_v28 = vsel %vm228_vm2, %v2096_v27, 0.0  ;;  %2011 = vmatprep.subr.mxu0 %v2258_v7 }
 0x35a   :  { %890 = vadd.xlane.f32.xlu1 %v889_v28  ;;  %v1228_v40 = vpop.permute.xlu0 %1227 }
 0x35b   :  { %v1076_v39 = vpop.permute.xlu1 %1075 }
 0x35c   :  { %v2098_v29 = vpop.eup %2097 }
 0x35d   :  { %v892_v30 = vsel %vm228_vm2, %v2098_v29, 0.0 }
 0x35e   :  { %893 = vadd.xlane.f32.xlu0 %v892_v30 }
 0x35f   :  { %v1152_v41 = vpop.permute.xlu1 %1151 }
 0x360   :  { %v2100_v31 = vpop.eup %2099 }
 0x361   :  { %v2102_v32 = vpop.eup %2101  ;;  %v895_v33 = vsel %vm228_vm2, %v2100_v31, 0.0 }
 0x362   :  { %896 = vadd.xlane.f32.xlu1 %v895_v33  ;;  %v898_v34 = vsel %vm228_vm2, %v2102_v32, 0.0 }
 0x363   :  { %899 = vadd.xlane.f32.xlu0 %v898_v34  ;;  %v1304_v43 = vpop.permute.xlu1 %1303 }
 0x364   :  { %v2481_v35 = vpop.eup %2103 }
 0x365   :  { %v2483_v36 = vpop.eup %2105  ;;  %v904_v37 = vsel %vm228_vm2, %v2481_v35, 0.0 }
 0x366   :  { %v901_v38 = vsel %vm228_vm2, %v2483_v36, 0.0 }
 0x367   :  { %905 = vadd.xlane.f32.xlu0 %v904_v37  ;;  %902 = vadd.xlane.f32.xlu1 %v901_v38  ;;  %v1675_v38 = vld [vmem:[#allocation8 + $0x18] sm:$0xff] }
 0x378   :  { %1455 = vrot.lane.b32.xlu1 %v2396_v19, %s2264_s16 }
 0x37d   :  { %1379 = vrot.lane.b32.xlu0 %v2391_v18, %s2264_s16 }
 0x38b   :  { %v888_v42 = vpop.xlane.xlu0 %887 }
 0x38c   :  { %2107 = vrcp.f32 %v888_v42  ;;  %v1763_v42 = vld [vmem:[#allocation10 + $0x18] sm:$0xff] }
 0x394   :  { %v885_v44 = vpop.xlane.xlu1 %884 }
 0x395   :  { %2109 = vrcp.f32 %v885_v44 }
 0x399   :  { %v2108_v45 = vpop.eup %2107 }
 0x39a   :  { %v916_v46 = vmul.f32 %v2108_v45, %v2467_v0 }
 0x39c   :  { %2009 = vmatmul.mubr.msk.f32.vlgmr.msra.gmra.mxu1 %vm228_vm2, %v916_v46 }
 0x39d   :  { %2017 = vmatpush3.msra.mxu1 %v1152_v41  ;;  %2018 = vmatprep.mubr.msk.f32.mxu1 %vm2261_vm1, %v2258_v7  ;;  %v1672_v41 = vld [vmem:[#allocation8] sm:$0xff] }
 0x39e   :  { %2026 = vmatprep.subr.mxu1 %v2258_v7 }
 0x3a2   :  { %v2110_v18 = vpop.eup %2109 }
 0x3a3   :  { %v915_v19 = vmul.f32 %v2110_v18, %v2471_v2 }
 0x3a5   :  { %2004 = vmatmul.mubr.msk.f32.vlgmr.msra.gmra.mxu0 %vm228_vm2, %v915_v19 }
 0x3a6   :  { %2012 = vmatpush3.msra.mxu0 %v1076_v39  ;;  %2013 = vmatprep.mubr.msk.f32.mxu0 %vm2261_vm1, %v2258_v7  ;;  %v1674_v39 = vld [vmem:[#allocation8 + $0x10] sm:$0xff] }
 0x3a7   :  { %2021 = vmatprep.subr.mxu0 %v2258_v7 }
 0x3e3   :  { %v891_v47 = vpop.xlane.xlu1 %890 }
 0x3e4   :  { %2111 = vrcp.f32 %v891_v47 }
 0x3e7   :  { %v894_v48 = vpop.xlane.xlu0 %893 }
 0x3e8   :  { %2113 = vrcp.f32 %v894_v48 }
 0x3eb   :  { %v897_v49 = vpop.xlane.xlu1 %896 }
 0x3ec   :  { %2115 = vrcp.f32 %v897_v49  ;;  %v900_v50 = vpop.xlane.xlu0 %899 }
 0x3ed   :  { %2117 = vrcp.f32 %v900_v50 }
 0x3f0   :  { %v906_v51 = vpop.xlane.xlu0 %905  ;;  %v903_v52 = vpop.xlane.xlu1 %902 }
 0x3f1   :  { %v2112_v53 = vpop.eup %2111  ;;  %2119 = vrcp.f32 %v906_v51 }
 0x3f2   :  { %2121 = vrcp.f32 %v903_v52  ;;  %v917_v54 = vmul.f32 %v2112_v53, %v2096_v27 }
 0x3f4   :  { %2014 = vmatmul.mubr.msk.f32.vlgmr.msra.gmra.mxu0 %vm228_vm2, %v917_v54  ;;  %v1380_v61 = vpop.permute.xlu0 %1379  ;;  %v1456_v62 = vpop.permute.xlu1 %1455 }
 0x3f5   :  { %v2114_v55 = vpop.eup %2113  ;;  %2022 = vmatpush3.msra.mxu0 %v1228_v40  ;;  %2023 = vmatprep.mubr.msk.f32.mxu0 %vm2261_vm1, %v2258_v7  ;;  %v1673_v40 = vld [vmem:[#allocation8 + $0x8] sm:$0xff] }
 0x3f6   :  { %v918_v56 = vmul.f32 %v2114_v55, %v2098_v29  ;;  %2031 = vmatprep.subr.mxu0 %v2258_v7 }
 0x3f8   :  { %2019 = vmatmul.mubr.msk.f32.vlgmr.msra.gmra.mxu1 %vm228_vm2, %v918_v56 }
 0x3f9   :  { %v2116_v57 = vpop.eup %2115  ;;  %2027 = vmatpush3.msra.mxu1 %v1304_v43  ;;  %2028 = vmatprep.mubr.msk.f32.mxu1 %vm2261_vm1, %v2258_v7  ;;  %v1889_v43 = vld [vmem:[%s2559_s4] ss:$0 sm:$0xff] }
 0x3fa   :  { %v2118_v58 = vpop.eup %2117  ;;  %2036 = vmatprep.subr.mxu1 %v2258_v7  ;;  %v919_v59 = vmul.f32 %v2116_v57, %v2100_v31 }
 0x3fb   :  { %v920_v60 = vmul.f32 %v2118_v58, %v2102_v32 }
 0x3fc   :  { %2024 = vmatmul.mubr.msk.f32.vlgmr.msra.gmra.mxu0 %vm228_vm2, %v919_v59 }
 0x3fd   :  { %2029 = vmatmul.mubr.msk.f32.vlgmr.msra.gmra.mxu1 %vm228_vm2, %v920_v60  ;;  %2032 = vmatpush3.msra.mxu0 %v1380_v61 }
 0x3fe   :  { %v2120_v63 = vpop.eup %2119  ;;  %2037 = vmatpush3.msra.mxu1 %v1456_v62  ;;  %2038 = vmatprep.mubr.msk.f32.mxu1 %vm2261_vm1, %v2258_v7 }
 0x3ff   :  { %v2122_v0 = vpop.eup %2121  ;;  %2033 = vmatprep.mubr.msk.f32.mxu0 %vm2261_vm1, %v2258_v7  ;;  %v922_v1 = vmul.f32 %v2120_v63, %v2481_v35  ;;  %2052 = vmatprep.subr.mxu1 %v2258_v7  ;;  %v1762_v63 = vld [vmem:[#allocation10 + $0x10] sm:$0xff] }
 0x400   :  { %v921_v2 = vmul.f32 %v2122_v0, %v2483_v36  ;;  %2041 = vmatprep.subr.mxu0 %v1566_v8  ;;  %v1761_v0 = vld [vmem:[#allocation10 + $0x8] sm:$0xff] }
 0x401   :  { %2039 = vmatmul.mubr.msk.f32.vlgmr.msra.gmra.mxu1 %vm228_vm2, %v922_v1  ;;  %v1760_v1 = vld [vmem:[#allocation10] sm:$0xff] }
 0x402   :  { %2034 = vmatmul.mubr.msk.f32.vlgmr.msra.gmra.mxu0 %vm228_vm2, %v921_v2  ;;  %2060 = vmatprep.mubr.msk.f32.mxu1 %vm2261_vm1, %v2258_v7  ;;  %v1892_v2 = vld [vmem:[%s2561_s6] ss:$0 sm:$0xff] }
 0x403   :  { %2042 = vmatpush3.msra.mxu0 %v1566_v8  ;;  %2053 = vmatpush3.msra.mxu1 %v1675_v38  ;;  %v1894_v8 = vld [vmem:[%s2563_s8] ss:$0 sm:$0xff] }
 0x404   :  { %2043 = vmatprep.subr.mxu0 %v1565_v9  ;;  %2054 = vmatprep.subr.mxu1 %v2258_v7 }
 0x405   :  { %2044 = vmatpush3.msra.mxu0 %v1565_v9  ;;  %2055 = vmatpush3.msra.mxu1 %v1674_v39 }
 0x406   :  { %2045 = vmatprep.subr.mxu0 %v1564_v10  ;;  %2056 = vmatprep.subr.mxu1 %v2258_v7 }
 0x407   :  { %2046 = vmatpush3.msra.mxu0 %v1564_v10  ;;  %2057 = vmatpush3.msra.mxu1 %v1673_v40 }
 0x408   :  { %2047 = vmatprep.subr.mxu0 %v1563_v13  ;;  %2058 = vmatprep.subr.mxu1 %v2258_v7 }
 0x409   :  { %2048 = vmatpush3.msra.mxu0 %v1563_v13  ;;  %2059 = vmatpush3.msra.mxu1 %v1672_v41 }
 0x40a   :  { %2063 = vmatprep.subr.mxu0 %v2258_v7 }
 0x45c   :  { %v1071_v3 = vpop.f32.mrf.mxu1 }
 0x45e   :  { %v2010_v4 = vpop.f32.mrf.mxu1 }
 0x465   :  { %v995_v5 = vpop.f32.mrf.mxu0 }
 0x467   :  { %v2005_v6 = vpop.f32.mrf.mxu0 }
 0x4b4   :  { %v1147_v11 = vpop.f32.mrf.mxu0 }
 0x4b5   :  { %1533 = vrot.lane.b32.xlu0 %v1147_v11, %s2254_s15 }
 0x4b6   :  { %v2015_v12 = vpop.f32.mrf.mxu0 }
 0x4b8   :  { %v1223_v14 = vpop.f32.mrf.mxu1 }
 0x4b9   :  { %1535 = vrot.lane.b32.xlu1 %v1223_v14, %s2254_s15 }
 0x4ba   :  { %v2020_v15 = vpop.f32.mrf.mxu1 }
 0x4bc   :  { %v1299_v16 = vpop.f32.mrf.mxu0 }
 0x4bd   :  { %v1375_v17 = vpop.f32.mrf.mxu1  ;;  %1541 = vrot.lane.b32.xlu0 %v1299_v16, %s2265_s17 }
 0x4be   :  { %1543 = vrot.lane.b32.xlu1 %v1375_v17, %s2265_s17  ;;  %v2025_v20 = vpop.f32.mrf.mxu0 }
 0x4bf   :  { %v2030_v21 = vpop.f32.mrf.mxu1 }
 0x4c1   :  { %v1527_v22 = vpop.f32.mrf.mxu1 }
 0x4c2   :  { %v1451_v23 = vpop.f32.mrf.mxu0  ;;  %1551 = vrot.lane.b32.xlu1 %v1527_v22, %s2266_s18 }
 0x4c3   :  { %1549 = vrot.lane.b32.xlu0 %v1451_v23, %s2266_s18  ;;  %v2040_v24 = vpop.f32.mrf.mxu1 }
 0x4c4   :  { %v2035_v25 = vpop.f32.mrf.mxu0 }
 0x527   :  { %v1534_v26 = vpop.permute.xlu0 %1533 }
 0x528   :  { %v1555_v30 = vsel %vm228_vm2, %v995_v5, %v1534_v26 }
 0x52b   :  { %v1536_v27 = vpop.permute.xlu1 %1535 }
 0x52c   :  { %v1556_v32 = vsel %vm228_vm2, %v1071_v3, %v1536_v27 }
 0x52f   :  { %v1542_v28 = vpop.permute.xlu0 %1541 }
 0x530   :  { %v1544_v29 = vpop.permute.xlu1 %1543  ;;  %v1558_v33 = vsel %vm1557_vm3, %v1555_v30, %v1542_v28 }
 0x531   :  { %v1559_v35 = vsel %vm1557_vm3, %v1556_v32, %v1544_v29 }
 0x534   :  { %v1552_v31 = vpop.permute.xlu1 %1551 }
 0x535   :  { %v1550_v34 = vpop.permute.xlu0 %1549  ;;  %v1562_v37 = vsel %vm1560_vm4, %v1559_v35, %v1552_v31 }
 0x536   :  { %v1561_v36 = vsel %vm1560_vm4, %v1558_v33, %v1550_v34 }
 0x537   :  { %2049 = vmatprep.mubr.msk.f32.mxu0 %vm114_vm0, %v1561_v36 }
 0x538   :  { %2050 = vmatmul.mubr.msk.f32.vlgmr.msra.gmra.mxu0 %vm114_vm0, %v1562_v37 }
 0x539   :  { %2071 = vmatprep.mubr.msk.f32.mxu0 %vm2261_vm1, %v2258_v7  ;;  %2064 = vmatpush3.msra.mxu0 %v1763_v42 }
 0x53a   :  { %2065 = vmatprep.subr.mxu0 %v2258_v7 }
 0x53b   :  { %2066 = vmatpush3.msra.mxu0 %v1762_v63 }
 0x53c   :  { %2067 = vmatprep.subr.mxu0 %v2258_v7 }
 0x53d   :  { %2068 = vmatpush3.msra.mxu0 %v1761_v0 }
 0x53e   :  { %2069 = vmatprep.subr.mxu0 %v2258_v7 }
 0x53f   :  { %2070 = vmatpush3.msra.mxu0 %v1760_v1 }
 0x5f8   :  { %v2051_v44 = vpop.f32.mrf.mxu0 }
 0x5f9   :  { %v1652_v45 = vadd.f32 %v2051_v44, %v1889_v43 }
 0x5fa   :  { %v1646_v46 = vpop.f32.mrf.mxu0 }
 0x5fb   :  { %v1662_v18 = vsel %vm114_vm0, %v1652_v45, 0.0  ;;  %v1647_v19 = vadd.f32 %v1889_v43, %v1646_v46 }
 0x5fc   :  { %v1663_v47 = vrot.slane %v1662_v18, 4 }
 0x5fd   :  { %v1655_v48 = vsel %vm114_vm0, %v1647_v19, 0.0 }
 0x5fe   :  { %v1664_v49 = vadd.f32 %v1663_v47, %v1662_v18  ;;  %v1656_v50 = vrot.slane %v1655_v48, 4 }
 0x600   :  { %v1665_v51 = vrot.slane %v1664_v49, 2  ;;  %v1657_v52 = vadd.f32 %v1656_v50, %v1655_v48 }
 0x602   :  { %v1666_v53 = vadd.f32 %v1665_v51, %v1664_v49  ;;  %v1658_v54 = vrot.slane %v1657_v52, 2 }
 0x604   :  { %v1667_v55 = vrot.slane %v1666_v53, 1  ;;  %v1659_v56 = vadd.f32 %v1658_v54, %v1657_v52 }
 0x606   :  { %v1668_v57 = vadd.f32 %v1667_v55, %v1666_v53  ;;  %v1660_v58 = vrot.slane %v1659_v56, 1 }
 0x608   :  { %v1661_v59 = vadd.f32 %v1660_v58, %v1659_v56  ;;  %v1671_v60 = vmul.f32 0.125, %v1668_v57 }
 0x60a   :  { %v1670_v61 = vmul.f32 0.125, %v1661_v59 }
 0x60c   :  { %v1686_v62 = vsel %vm1685_vm5, %v1671_v60, %v1670_v61 }
 0x60d   :  { %2061 = vmatmul.mubr.msk.f32.vlgmr.msra.gmra.mxu1 %vm114_vm0, %v1686_v62 }
 0x6cd   :  { %v1755_v3 = vpop.f32.mrf.mxu1 }
 0x6ce   :  { %v1756_v4 = vadd.f32 %v1892_v2, %v1755_v3 }
 0x6cf   :  { %v2062_v5 = vpop.f32.mrf.mxu1 }
 0x6d0   :  { %v1759_v6 = vmax.f32 %v1756_v4, 0.0 }
 0x6d2   :  { %2072 = vmatmul.mubr.msk.f32.vlgmr.msra.gmra.mxu0 %vm114_vm0, %v1759_v6 }
 0x792   :  { %v1840_v9 = vpop.f32.mrf.mxu0 }
 0x793   :  { %v1841_v10 = vadd.f32 %v1894_v8, %v1840_v9 }
 0x794   :  { %v2073_v7 = vpop.f32.mrf.mxu0 }
 0x795   :  { %1844 = vst [vmem:[#allocation11] sm:$0x3] %v1841_v10 }
 0x796   :  { %2234 = shalt.err (!%p2231_p1)
}
 0x797   :  { %1854 = dma.vmem_to_hbm [thread:$0]  %s1852_s24, 32, %s2564_s9, [#allocation4]  }
 0x798   :  { %2249 = dma.done.wait [#allocation4], 32  }
 0x799   :  { %2250 = vsyncadd [#allocation4], 4294967264 }
 0x79a   :  { %1858 = vsyncpa [#allocation3], 1 }
 0x79b   :  { %1859 = vsyncpa [#allocation6], 1 }
 0x79c   :  { %1860 = vsyncpa [#allocation9], 1 }
 0x79d   :  { %1861 = vsyncpa [#allocation4], 1 }

</bundles_post_ra>
